<compile_context>
chip_gen: v5e
topology: v5e:2x2
jax: 0.10.0
libtpu: 0.0.40
codegen_flags: <defaults>
</compile_context>

<pallas_src>
import functools

import jax
import jax.numpy as jnp
from jax.experimental import pallas as pl
from jax.experimental.pallas import tpu as pltpu


def ffn_kernel(x_ref, w1_ref, w2_ref, w3_ref, o_ref):
    # Layer 1: relu(x @ W1t).  W1t is already [in, l1] -> standard MXU issue.
    h1 = jnp.dot(x_ref[...], w1_ref[...], preferred_element_type=jnp.float32)
    h1 = jnp.maximum(h1, 0.0).astype(w2_ref.dtype)      # carry bf16 between dots
    # Layer 2: relu(h1 @ W2t)
    h2 = jnp.dot(h1, w2_ref[...], preferred_element_type=jnp.float32)
    h2 = jnp.maximum(h2, 0.0).astype(w3_ref.dtype)
    # Output layer: softsign(h2 @ W3t) = z / (1 + |z|)
    z = jnp.dot(h2, w3_ref[...], preferred_element_type=jnp.float32)
    inv = pl.reciprocal(1.0 + jnp.abs(z), approx=True)   # EUP vrcp; denom >= 1
    o_ref[...] = (z * inv).astype(o_ref.dtype)


def _round_up(n, m):
    return ((n + m - 1) // m) * m


@functools.lru_cache(maxsize=None)
def _vmem_capacity_bytes():
    try:
        cap = int(pltpu.get_tpu_info().vmem_capacity_bytes)
        if cap > 0:
            return cap
    except Exception:
        pass
    return 64 * 1024 * 1024  # conservative fallback (v7x-sized per-TC VMEM)


def _vmem_bytes(tb, in_f, l1, l2, out_f, act_item, w_item, out_item):
    # Activation in/out tiles are double-buffered by the Pallas pipeline.
    acts = 2 * tb * in_f * act_item + 2 * tb * out_f * out_item
    # Constant-index weight blocks are DMA'd once but still get 2 pipeline
    # buffers each by default -> count them 2x.
    weights = 2 * (l1 * in_f + l2 * l1 + out_f * l2) * w_item
    # f32 accumulators + bf16 copies carried between the chained dots.
    inter = tb * (l1 + l2 + out_f) * 4 + tb * (l1 + l2) * w_item
    return acts + weights + inter


def _pick_batch_tile(B, in_f, l1, l2, out_f, act_item, w_item, out_item,
                     max_tile, vmem_budget, align):
    """Largest batch tile (<= max_tile, multiple of `align`) within the budget,
    capped so the grid keeps >= 2 steps when the batch allows (v7x: 2 TCs)."""
    tb = _round_up(min(max_tile, _round_up(B, align)), align)
    if B >= 2 * align:
        tb = min(tb, _round_up(-(-B // 2), align))
    while tb > align and _vmem_bytes(tb, in_f, l1, l2, out_f,
                                     act_item, w_item, out_item) > vmem_budget:
        tb = max(_round_up(tb // 2, align), align)
    return max(tb, align)


@functools.partial(jax.jit, static_argnames=("block_batch", "compute_dtype"))
def fastforward_nn(x, w1, w2, w3, *, block_batch=None, compute_dtype=jnp.bfloat16):
    """Fused forward of FastforwardNN.

    x:  [B, input_size]
    w1: [layer1_size, input_size]   (PyTorch nn.Linear weight layout [out, in])
    w2: [layer2_size, layer1_size]
    w3: [output_size, layer2_size]
    """
    B, in_f = x.shape
    l1, l2, out_f = w1.shape[0], w2.shape[0], w3.shape[0]
    out_dtype = x.dtype

    cdt = jnp.dtype(compute_dtype)
    act_item = cdt.itemsize
    w_item = cdt.itemsize
    out_item = jnp.dtype(out_dtype).itemsize
    align = 16 if cdt.itemsize < 4 else 8  # bf16 sublane packing needs 16

    cap = _vmem_capacity_bytes()
    vmem_budget = int(cap * 0.70)
    vmem_limit = int(cap * 0.80)
    max_tile = block_batch if block_batch is not None else (
        2048 if cap >= (96 << 20) else 1024)

    tb = _pick_batch_tile(B, in_f, l1, l2, out_f, act_item, w_item, out_item,
                          max_tile, vmem_budget, align)
    Bp = _round_up(B, tb)
    grid = (Bp // tb,)

    # One-time wrapper-side transpose + cast: kernel consumes standard [K, N]
    # weights in bf16; cost is amortized over the whole grid.
    xp = x.astype(cdt)
    if Bp != B:
        xp = jnp.pad(xp, ((0, Bp - B), (0, 0)))
    w1t = w1.T.astype(cdt)   # [in_f, l1]
    w2t = w2.T.astype(cdt)   # [l1, l2]
    w3t = w3.T.astype(cdt)   # [l2, out_f]

    flops = 2 * Bp * (in_f * l1 + l1 * l2 + l2 * out_f)
    bytes_accessed = (xp.size * act_item
                      + (w1t.size + w2t.size + w3t.size) * w_item
                      + Bp * out_f * out_item)
    cost = pl.CostEstimate(flops=flops,
                           transcendentals=Bp * out_f,
                           bytes_accessed=bytes_accessed)

    out = pl.pallas_call(
        ffn_kernel,
        out_shape=jax.ShapeDtypeStruct((Bp, out_f), out_dtype),
        grid=grid,
        in_specs=[
            pl.BlockSpec((tb, in_f), lambda i: (i, 0)),    # activation tile
            pl.BlockSpec((in_f, l1), lambda i: (0, 0)),    # weights stay
            pl.BlockSpec((l1, l2), lambda i: (0, 0)),      #   resident in VMEM
            pl.BlockSpec((l2, out_f), lambda i: (0, 0)),   #   across the grid
        ],
        out_specs=pl.BlockSpec((tb, out_f), lambda i: (i, 0)),
        compiler_params=pltpu.CompilerParams(
            dimension_semantics=("parallel",),
            vmem_limit_bytes=vmem_limit,
        ),
        cost_estimate=cost,
    )(xp, w1t, w2t, w3t)

    return out[:B] if Bp != B else out


def _linear_init(key, out_f, in_f):
    # Deterministic stand-in for PyTorch's default nn.Linear init
    # (uniform(-1/sqrt(in_f), 1/sqrt(in_f))).
    bound = 1.0 / jnp.sqrt(jnp.float32(in_f))
    return jax.random.uniform(
        key, (out_f, in_f), dtype=jnp.float32, minval=-bound, maxval=bound
    )


if __name__ == "__main__":
    # Small shapes consistent with the module's forward.
    batch = 8
    input_size = 32
    layer1_size = 64
    layer2_size = 64
    output_size = 16

    key = jax.random.PRNGKey(0)
    kx, k1, k2, k3 = jax.random.split(key, 4)

    x = jax.random.normal(kx, (batch, input_size), dtype=jnp.float32)
    w1 = _linear_init(k1, layer1_size, input_size)
    w2 = _linear_init(k2, layer2_size, layer1_size)
    w3 = _linear_init(k3, output_size, layer2_size)

    out = jax.block_until_ready(fastforward_nn(x, w1, w2, w3))

    # Pure-JAX f32 reference of the fused forward (kernel runs bf16 dots with
    # f32 accumulation, so compare with a bf16-appropriate tolerance; the
    # softsign output is bounded in (-1, 1)).
    h1 = jnp.maximum(x @ w1.T, 0.0)
    h2 = jnp.maximum(h1 @ w2.T, 0.0)
    z = h2 @ w3.T
    ref = z / (1.0 + jnp.abs(z))
    assert out.shape == ref.shape, "shape mismatch vs reference"
    max_err = float(jnp.max(jnp.abs(out - ref)))
    assert max_err < 3e-2, f"mismatch vs reference (max abs err = {max_err})"

    # TODO(synk): Adam optimizer / MSELoss / replay-memory set are training
    # machinery outside forward() and are intentionally not translated.

    print("KERNEL_OK")
</pallas_src>

<mosaic_0001>
module attributes {stable_mosaic.version = 11 : i64} {
  func.func @ffn_kernel(%arg0: i32, %arg1: memref<16x32xbf16, #tpu.memory_space<vmem>>, %arg2: memref<32x64xbf16, #tpu.memory_space<vmem>>, %arg3: memref<64x64xbf16, #tpu.memory_space<vmem>>, %arg4: memref<64x16xbf16, #tpu.memory_space<vmem>>, %arg5: memref<16x16xf32, #tpu.memory_space<vmem>>) attributes {dimension_semantics = [#tpu.dimension_semantics<parallel>], iteration_bounds = array<i64: 1>, scalar_prefetch = 0 : i64, scratch_operands = 0 : i64, tpu.core_type = #tpu.core_type<tc>, window_params = [{transform_indices = @transform_0, window_bounds = array<i64: 16, 32>}, {pipeline_mode = #tpu.pipeline_mode<synchronous>, transform_indices = @transform_1, window_bounds = array<i64: 32, 64>}, {pipeline_mode = #tpu.pipeline_mode<synchronous>, transform_indices = @transform_2, window_bounds = array<i64: 64, 64>}, {pipeline_mode = #tpu.pipeline_mode<synchronous>, transform_indices = @transform_3, window_bounds = array<i64: 64, 16>}, {transform_indices = @transform_4, window_bounds = array<i64: 16, 16>}]} {
    %c0 = arith.constant 0 : index
    %c0_0 = arith.constant 0 : index
    %0 = vector.load %arg1[%c0, %c0_0] : memref<16x32xbf16, #tpu.memory_space<vmem>>, vector<16x32xbf16>
    %c0_1 = arith.constant 0 : index
    %c0_2 = arith.constant 0 : index
    %1 = vector.load %arg2[%c0_1, %c0_2] : memref<32x64xbf16, #tpu.memory_space<vmem>>, vector<32x64xbf16>
    %cst = arith.constant dense<0.000000e+00> : vector<16x64xf32>
    %2 = tpu.matmul %0, %1, %cst {dimension_numbers = #tpu.dot_dimension_numbers<[1], [0], [0], [1], [0, 0, 1, 1], [], []>} : vector<16x32xbf16>, vector<32x64xbf16>, vector<16x64xf32> -> vector<16x64xf32>
    %cst_3 = arith.constant 0.000000e+00 : f32
    %3 = vector.broadcast %cst_3 : f32 to vector<16x64xf32>
    %4 = arith.maximumf %2, %3 : vector<16x64xf32>
    %5 = arith.truncf %4 : vector<16x64xf32> to vector<16x64xbf16>
    %c0_4 = arith.constant 0 : index
    %c0_5 = arith.constant 0 : index
    %6 = vector.load %arg3[%c0_4, %c0_5] : memref<64x64xbf16, #tpu.memory_space<vmem>>, vector<64x64xbf16>
    %cst_6 = arith.constant dense<0.000000e+00> : vector<16x64xf32>
    %7 = tpu.matmul %5, %6, %cst_6 {dimension_numbers = #tpu.dot_dimension_numbers<[1], [0], [0], [1], [0, 0, 1, 1], [], []>} : vector<16x64xbf16>, vector<64x64xbf16>, vector<16x64xf32> -> vector<16x64xf32>
    %cst_7 = arith.constant 0.000000e+00 : f32
    %8 = vector.broadcast %cst_7 : f32 to vector<16x64xf32>
    %9 = arith.maximumf %7, %8 : vector<16x64xf32>
    %10 = arith.truncf %9 : vector<16x64xf32> to vector<16x64xbf16>
    %c0_8 = arith.constant 0 : index
    %c0_9 = arith.constant 0 : index
    %11 = vector.load %arg4[%c0_8, %c0_9] : memref<64x16xbf16, #tpu.memory_space<vmem>>, vector<64x16xbf16>
    %cst_10 = arith.constant dense<0.000000e+00> : vector<16x16xf32>
    %12 = tpu.matmul %10, %11, %cst_10 {dimension_numbers = #tpu.dot_dimension_numbers<[1], [0], [0], [1], [0, 0, 1, 1], [], []>} : vector<16x64xbf16>, vector<64x16xbf16>, vector<16x16xf32> -> vector<16x16xf32>
    %13 = math.absf %12 : vector<16x16xf32>
    %cst_11 = arith.constant 1.000000e+00 : f32
    %14 = vector.broadcast %cst_11 : f32 to vector<16x16xf32>
    %15 = arith.addf %14, %13 : vector<16x16xf32>
    %16 = tpu.reciprocal %15 {approx = true} : vector<16x16xf32> -> vector<16x16xf32>
    %17 = arith.mulf %12, %16 : vector<16x16xf32>
    %c0_12 = arith.constant 0 : index
    %c0_13 = arith.constant 0 : index
    %18 = vector.load %arg5[%c0_12, %c0_13] : memref<16x16xf32, #tpu.memory_space<vmem>>, vector<16x16xf32>
    tpu.vector_store %arg5[%c0_12, %c0_13], %17 {strides = array<i32>} : memref<16x16xf32, #tpu.memory_space<vmem>>, vector<16x16xf32>,
    return
  }
  func.func @transform_0(%arg0: i32) -> (i32, i32) {
    %c0_i32 = arith.constant 0 : i32
    %c0_i32_0 = arith.constant 0 : i32
    return %arg0, %c0_i32 : i32, i32
  }
  func.func @transform_1(%arg0: i32) -> (i32, i32) {
    %c0_i32 = arith.constant 0 : i32
    %c0_i32_0 = arith.constant 0 : i32
    %c0_i32_1 = arith.constant 0 : i32
    return %c0_i32, %c0_i32_0 : i32, i32
  }
  func.func @transform_2(%arg0: i32) -> (i32, i32) {
    %c0_i32 = arith.constant 0 : i32
    %c0_i32_0 = arith.constant 0 : i32
    %c0_i32_1 = arith.constant 0 : i32
    return %c0_i32, %c0_i32_0 : i32, i32
  }
  func.func @transform_3(%arg0: i32) -> (i32, i32) {
    %c0_i32 = arith.constant 0 : i32
    %c0_i32_0 = arith.constant 0 : i32
    %c0_i32_1 = arith.constant 0 : i32
    return %c0_i32, %c0_i32_0 : i32, i32
  }
  func.func @transform_4(%arg0: i32) -> (i32, i32) {
    %c0_i32 = arith.constant 0 : i32
    %c0_i32_0 = arith.constant 0 : i32
    return %arg0, %c0_i32 : i32, i32
  }
}

</mosaic_0001>

<bundles_post_ra>
// kernel: fastforward_nn.1
= control target key start
LH: loop header
LB: loop body
LE: loop exit
PB: predicated region body
PF: predicated region fallthrough
CT: control target
= control target key end

     0   :  { %vm41_vm0 = vcmask 261120   ;;  %vm94_vm1 = vcmask 523264   ;;  %vm172_vm2 = vcmask 130048   ;;  %s305_s1 = inlined_call_operand.vmem [shape: bf16[32,64], index: 1, kind: input, shape index: {}]   ;;  %s306_s2 = inlined_call_operand.vmem [shape: bf16[64,64], index: 2, kind: input, shape index: {}]   ;;  %s307_s0 = inlined_call_operand.vmem [shape: bf16[16,32], index: 0, kind: input, shape index: {}]   ;;  %s308_s3 = inlined_call_operand.vmem [shape: bf16[64,16], index: 3, kind: input, shape index: {}]   ;;  %s309_s4 = inlined_call_operand.vmem [shape: f32[16,16], index: 4, kind: output, shape index: {}]  }
   0x1   :  { %v228_v0 = vld [vmem:[%s305_s1 + $0x8] sm:$0xff]  ;;  %v232_v1 = vld [vmem:[%s306_s2 + $0x18] sm:$0xff]  ;;  %v227_v2 = vld [vmem:[%s305_s1] sm:$0xff] }
   0x2   :  { %51 = vmatpush.bf16.msra.mxu0 %v228_v0  ;;  %102 = vmatpush.bf16.msra.mxu1 %v232_v1  ;;  %v226_v3 = vld [vmem:[%s307_s0] sm:$0xff]  ;;  %v231_v4 = vld [vmem:[%s306_s2 + $0x10] sm:$0xff]  ;;  %v230_v5 = vld [vmem:[%s306_s2 + $0x8] sm:$0xff] }
   0x3   :  { %v229_v6 = vld [vmem:[%s306_s2] sm:$0xff]  ;;  %v236_v7 = vld [vmem:[%s308_s3 + $0x18] sm:$0xff]  ;;  %v235_v13 = vld [vmem:[%s308_s3 + $0x10] sm:$0xff] }
   0x4   :  { %154 = vmatpush.bf16.msra.mxu2 %v236_v7  ;;  %v234_v14 = vld [vmem:[%s308_s3 + $0x8] sm:$0xff]  ;;  %v233_v15 = vld [vmem:[%s308_s3] sm:$0xff] }
   0x6   :  { %52 = vmatpush.bf16.msra.mxu0 %v227_v2  ;;  %103 = vmatpush.bf16.msra.mxu1 %v231_v4 }
   0x8   :  { %155 = vmatpush.bf16.msra.mxu2 %v235_v13 }
   0x9   :  { %191 = vmatmul.msk.bf16.vlgmr.msra.gmra.mxu0 %vm41_vm0, %v226_v3 }
   0xa   :  { %104 = vmatpush.bf16.msra.mxu1 %v230_v5 }
   0xc   :  { %156 = vmatpush.bf16.msra.mxu2 %v234_v14 }
   0xe   :  { %105 = vmatpush.bf16.msra.mxu1 %v229_v6 }
  0x10   :  { %157 = vmatpush.bf16.msra.mxu2 %v233_v15 }
  0x86   :  { %v54_v8 = vpop.f32.mrf.mxu0 }
  0x87   :  { %v59_v10 = vmax.f32 %v54_v8, 0.0 }
  0x8e   :  { %v56_v9 = vpop.f32.mrf.mxu0 }
  0x8f   :  { %v60_v11 = vmax.f32 %v56_v9, 0.0 }
  0x91   :  { %v61_v12 = vpack.c.bf16 %v60_v11, %v59_v10 }
  0x93   :  { %208 = vmatmul.msk.bf16.vlgmr.msra.gmra.mxu1 %vm94_vm1, %v61_v12 }
 0x110   :  { %v107_v16 = vpop.f32.mrf.mxu1 }
 0x111   :  { %v112_v18 = vmax.f32 %v107_v16, 0.0 }
 0x118   :  { %v109_v17 = vpop.f32.mrf.mxu1 }
 0x119   :  { %v113_v19 = vmax.f32 %v109_v17, 0.0 }
 0x11b   :  { %v114_v20 = vpack.c.bf16 %v113_v19, %v112_v18 }
 0x11d   :  { %225 = vmatmul.msk.bf16.vlgmr.msra.gmra.mxu2 %vm94_vm1, %v114_v20 }
 0x1a0   :  { %v159_v21 = vpop.f32.mrf.mxu2 }
 0x1a1   :  { %v164_v22 = vand.u32 2147483647, %v159_v21 }
 0x1a3   :  { %v166_v23 = vadd.f32 1.0, %v164_v22 }
 0x1a5   :  { %237 = vrcp.f32 %v166_v23 }
 0x1a8   :  { %v161_v24 = vpop.f32.mrf.mxu2 }
 0x1a9   :  { %v165_v25 = vand.u32 2147483647, %v161_v24 }
 0x1ab   :  { %v238_v26 = vpop.eup %237  ;;  %v167_v27 = vadd.f32 1.0, %v165_v25 }
 0x1ac   :  { %v170_v28 = vmul.f32 %v238_v26, %v159_v21 }
 0x1ad   :  { %239 = vrcp.f32 %v167_v27 }
 0x1ae   :  { %173 = vst.msk [vmem:[%s309_s4] sm:$0xff] %vm172_vm2, %v170_v28 }
 0x1b3   :  { %v240_v29 = vpop.eup %239 }
 0x1b4   :  { %v171_v30 = vmul.f32 %v240_v29, %v161_v24 }
 0x1b6   :  { %174 = vst.msk [vmem:[%s309_s4 + $0x8] sm:$0xff] %vm172_vm2, %v171_v30 }

</bundles_post_ra>
